<compile_context>
chip_gen: v5e
topology: v5e:2x2
jax: 0.10.0
libtpu: 0.0.40
codegen_flags: <defaults>
</compile_context>

<pallas_src>
import functools

import jax
import jax.numpy as jnp
from jax.experimental import pallas as pl
from jax.experimental.pallas import tpu as pltpu


def _round_up(x, m):
    return ((x + m - 1) // m) * m


def _fc_softmax_kernel(x_ref, w1_ref, b1_ref, w2_ref, b2_ref, o_ref):
    # fc1: (TB, in) @ (in, H_pad) -> f32 accumulate, bias add in f32
    h = jnp.dot(x_ref[...], w1_ref[...], preferred_element_type=jnp.float32)
    h = h + b1_ref[...]
    # fc2: cast activations to the weight compute dtype (bf16) for MXU rate
    logits = jnp.dot(h.astype(w2_ref.dtype), w2_ref[...],
                     preferred_element_type=jnp.float32)
    logits = logits + b2_ref[...]          # padded classes carry a -1e30 bias
    # numerically stable softmax over the class axis (dim=1 of the 2-D input)
    m = jnp.max(logits, axis=-1, keepdims=True)
    e = jnp.exp(logits - m)
    denom = jnp.sum(e, axis=-1, keepdims=True)
    o_ref[...] = (e * pl.reciprocal(denom, approx=True)).astype(o_ref.dtype)


@functools.partial(jax.jit, static_argnames=("block_b", "compute_dtype"))
def fully_connected_forward(x, w1, b1, w2, b2, *, block_b=512,
                            compute_dtype=jnp.bfloat16):
    """x: (B, in); w1: (in, H); b1: (1, H) or (H,); w2: (H, C); b2: (1, C) or (C,).

    Weights are stored transposed relative to PyTorch nn.Linear ((in, out)).
    Returns softmax(fc2(fc1(x))) of shape (B, C).
    """
    orig_dtype = x.dtype
    B, IN = x.shape
    H = w1.shape[1]
    C = w2.shape[1]

    # ---- pad hidden and class dims to full 128-lane vregs (math no-op) ----
    H_pad = _round_up(H, 128)
    C_pad = _round_up(C, 128)

    w1p = jnp.zeros((IN, H_pad), compute_dtype).at[:, :H].set(
        w1.astype(compute_dtype))
    b1p = jnp.zeros((1, H_pad), jnp.float32).at[:, :H].set(
        b1.reshape(1, -1).astype(jnp.float32))
    w2p = jnp.zeros((H_pad, C_pad), compute_dtype).at[:H, :C].set(
        w2.astype(compute_dtype))
    # padded class columns get a huge negative bias -> ~0 softmax mass
    b2p = jnp.full((1, C_pad), -1e30, jnp.float32).at[:, :C].set(
        b2.reshape(1, -1).astype(jnp.float32))

    # ---- tile the batch dimension ----
    TB = min(block_b, _round_up(B, 8))
    TB = _round_up(TB, 8)
    B_pad = _round_up(B, TB)
    xp = x.astype(compute_dtype)
    if B_pad != B:
        xp = jnp.zeros((B_pad, IN), compute_dtype).at[:B, :].set(xp)

    grid = (B_pad // TB,)

    out = pl.pallas_call(
        _fc_softmax_kernel,
        out_shape=jax.ShapeDtypeStruct((B_pad, C_pad), jnp.float32),
        grid=grid,
        in_specs=[
            pl.BlockSpec((TB, IN), lambda i: (i, 0)),        # x: streamed per tile
            pl.BlockSpec((IN, H_pad), lambda i: (0, 0)),     # w1: resident
            pl.BlockSpec((1, H_pad), lambda i: (0, 0)),      # b1: resident
            pl.BlockSpec((H_pad, C_pad), lambda i: (0, 0)),  # w2: resident
            pl.BlockSpec((1, C_pad), lambda i: (0, 0)),      # b2: resident
        ],
        out_specs=pl.BlockSpec((TB, C_pad), lambda i: (i, 0)),
        compiler_params=pltpu.CompilerParams(
            dimension_semantics=("parallel",)),
    )(xp, w1p, b1p, w2p, b2p)

    return out[:B, :C].astype(orig_dtype)


def init_params(key, in_features, out_features, n_classes, dtype=jnp.float32):
    """Deterministic synthetic init mimicking nn.Linear (uniform +/- 1/sqrt(fan_in))."""
    k1, k2, k3, k4 = jax.random.split(key, 4)
    bound1 = 1.0 / (in_features ** 0.5)
    bound2 = 1.0 / (out_features ** 0.5)
    # stored as (in, out) == transpose of PyTorch's (out, in)
    w1 = jax.random.uniform(k1, (in_features, out_features), dtype, -bound1, bound1)
    b1 = jax.random.uniform(k2, (1, out_features), dtype, -bound1, bound1)
    w2 = jax.random.uniform(k3, (out_features, n_classes), dtype, -bound2, bound2)
    b2 = jax.random.uniform(k4, (1, n_classes), dtype, -bound2, bound2)
    return w1, b1, w2, b2


if __name__ == "__main__":
    key = jax.random.PRNGKey(0)
    kx, kp = jax.random.split(key)

    B, in_features, out_features, n_classes = 64, 32, 64, 16
    x = jax.random.normal(kx, (B, in_features), jnp.float32)
    w1, b1, w2, b2 = init_params(kp, in_features, out_features, n_classes)

    # block_b=16 -> grid of 4 batch tiles even at this small demo size.
    out = fully_connected_forward(x, w1, b1, w2, b2, block_b=16)
    out = jax.block_until_ready(out)

    # reference in plain f32 JAX (kernel uses bf16 matmuls + approx reciprocal,
    # so tolerances are a bit looser than pure-f32)
    ref = jax.nn.softmax(jnp.dot(jnp.dot(x, w1) + b1, w2) + b2, axis=1)
    assert out.shape == (B, n_classes)
    assert jnp.allclose(out, ref, atol=2e-2, rtol=2e-2), float(
        jnp.max(jnp.abs(out - ref)))
    assert jnp.allclose(jnp.sum(out, axis=1), 1.0, atol=1e-2)

    print("KERNEL_OK")
</pallas_src>

<mosaic_0001>
module attributes {stable_mosaic.version = 11 : i64} {
  func.func @_fc_softmax_kernel(%arg0: i32, %arg1: memref<16x32xbf16, #tpu.memory_space<vmem>>, %arg2: memref<32x128xbf16, #tpu.memory_space<vmem>>, %arg3: memref<1x128xf32, #tpu.memory_space<vmem>>, %arg4: memref<128x128xbf16, #tpu.memory_space<vmem>>, %arg5: memref<1x128xf32, #tpu.memory_space<vmem>>, %arg6: memref<16x128xf32, #tpu.memory_space<vmem>>) attributes {dimension_semantics = [#tpu.dimension_semantics<parallel>], iteration_bounds = array<i64: 4>, scalar_prefetch = 0 : i64, scratch_operands = 0 : i64, tpu.core_type = #tpu.core_type<tc>, window_params = [{transform_indices = @transform_0, window_bounds = array<i64: 16, 32>}, {pipeline_mode = #tpu.pipeline_mode<synchronous>, transform_indices = @transform_1, window_bounds = array<i64: 32, 128>}, {pipeline_mode = #tpu.pipeline_mode<synchronous>, transform_indices = @transform_2, window_bounds = array<i64: 1, 128>}, {pipeline_mode = #tpu.pipeline_mode<synchronous>, transform_indices = @transform_3, window_bounds = array<i64: 128, 128>}, {pipeline_mode = #tpu.pipeline_mode<synchronous>, transform_indices = @transform_4, window_bounds = array<i64: 1, 128>}, {transform_indices = @transform_5, window_bounds = array<i64: 16, 128>}]} {
    %c0 = arith.constant 0 : index
    %c0_0 = arith.constant 0 : index
    %0 = vector.load %arg1[%c0, %c0_0] : memref<16x32xbf16, #tpu.memory_space<vmem>>, vector<16x32xbf16>
    %c0_1 = arith.constant 0 : index
    %c0_2 = arith.constant 0 : index
    %1 = vector.load %arg2[%c0_1, %c0_2] : memref<32x128xbf16, #tpu.memory_space<vmem>>, vector<32x128xbf16>
    %cst = arith.constant dense<0.000000e+00> : vector<16x128xf32>
    %2 = tpu.matmul %0, %1, %cst {dimension_numbers = #tpu.dot_dimension_numbers<[1], [0], [0], [1], [0, 0, 1, 1], [], []>} : vector<16x32xbf16>, vector<32x128xbf16>, vector<16x128xf32> -> vector<16x128xf32>
    %c0_3 = arith.constant 0 : index
    %c0_4 = arith.constant 0 : index
    %3 = vector.load %arg3[%c0_3, %c0_4] : memref<1x128xf32, #tpu.memory_space<vmem>>, vector<1x128xf32>
    %4 = vector.broadcast %3 : vector<1x128xf32> to vector<16x128xf32>
    %5 = arith.addf %2, %4 : vector<16x128xf32>
    %6 = arith.truncf %5 : vector<16x128xf32> to vector<16x128xbf16>
    %c0_5 = arith.constant 0 : index
    %c0_6 = arith.constant 0 : index
    %7 = vector.load %arg4[%c0_5, %c0_6] : memref<128x128xbf16, #tpu.memory_space<vmem>>, vector<128x128xbf16>
    %cst_7 = arith.constant dense<0.000000e+00> : vector<16x128xf32>
    %8 = tpu.matmul %6, %7, %cst_7 {dimension_numbers = #tpu.dot_dimension_numbers<[1], [0], [0], [1], [0, 0, 1, 1], [], []>} : vector<16x128xbf16>, vector<128x128xbf16>, vector<16x128xf32> -> vector<16x128xf32>
    %c0_8 = arith.constant 0 : index
    %c0_9 = arith.constant 0 : index
    %9 = vector.load %arg5[%c0_8, %c0_9] : memref<1x128xf32, #tpu.memory_space<vmem>>, vector<1x128xf32>
    %10 = vector.broadcast %9 : vector<1x128xf32> to vector<16x128xf32>
    %11 = arith.addf %8, %10 : vector<16x128xf32>
    %cst_10 = arith.constant dense<0xFF800000> : vector<16xf32>
    %12 = vector.multi_reduction <maximumf>, %11, %cst_10 [1] : vector<16x128xf32> to vector<16xf32>
    %13 = vector.shape_cast %12 : vector<16xf32> to vector<16x1xf32>
    %14 = vector.broadcast %13 : vector<16x1xf32> to vector<16x128xf32>
    %15 = arith.subf %11, %14 : vector<16x128xf32>
    %16 = math.exp %15 : vector<16x128xf32>
    %cst_11 = arith.constant dense<0.000000e+00> : vector<16xf32>
    %17 = vector.multi_reduction <add>, %16, %cst_11 [1] : vector<16x128xf32> to vector<16xf32>
    %18 = vector.shape_cast %17 : vector<16xf32> to vector<16x1xf32>
    %19 = tpu.reciprocal %18 {approx = true} : vector<16x1xf32> -> vector<16x1xf32>
    %20 = vector.broadcast %19 : vector<16x1xf32> to vector<16x128xf32>
    %21 = arith.mulf %16, %20 : vector<16x128xf32>
    %c0_12 = arith.constant 0 : index
    %c0_13 = arith.constant 0 : index
    %22 = vector.load %arg6[%c0_12, %c0_13] : memref<16x128xf32, #tpu.memory_space<vmem>>, vector<16x128xf32>
    tpu.vector_store %arg6[%c0_12, %c0_13], %21 {strides = array<i32>} : memref<16x128xf32, #tpu.memory_space<vmem>>, vector<16x128xf32>,
    return
  }
  func.func @transform_0(%arg0: i32) -> (i32, i32) {
    %c0_i32 = arith.constant 0 : i32
    %c0_i32_0 = arith.constant 0 : i32
    return %arg0, %c0_i32 : i32, i32
  }
  func.func @transform_1(%arg0: i32) -> (i32, i32) {
    %c0_i32 = arith.constant 0 : i32
    %c0_i32_0 = arith.constant 0 : i32
    %c0_i32_1 = arith.constant 0 : i32
    return %c0_i32, %c0_i32_0 : i32, i32
  }
  func.func @transform_2(%arg0: i32) -> (i32, i32) {
    %c0_i32 = arith.constant 0 : i32
    %c0_i32_0 = arith.constant 0 : i32
    %c0_i32_1 = arith.constant 0 : i32
    return %c0_i32, %c0_i32_0 : i32, i32
  }
  func.func @transform_3(%arg0: i32) -> (i32, i32) {
    %c0_i32 = arith.constant 0 : i32
    %c0_i32_0 = arith.constant 0 : i32
    %c0_i32_1 = arith.constant 0 : i32
    return %c0_i32, %c0_i32_0 : i32, i32
  }
  func.func @transform_4(%arg0: i32) -> (i32, i32) {
    %c0_i32 = arith.constant 0 : i32
    %c0_i32_0 = arith.constant 0 : i32
    %c0_i32_1 = arith.constant 0 : i32
    return %c0_i32, %c0_i32_0 : i32, i32
  }
  func.func @transform_5(%arg0: i32) -> (i32, i32) {
    %c0_i32 = arith.constant 0 : i32
    %c0_i32_0 = arith.constant 0 : i32
    return %arg0, %c0_i32 : i32, i32
  }
}

</mosaic_0001>

<bundles_post_ra>
// kernel: fully_connected_forward.1
= control target key start
LH: loop header
LB: loop body
LE: loop exit
PB: predicated region body
PF: predicated region fallthrough
CT: control target
= control target key end

     0   :  { %s556_s18 = smov 0   ;;  %s613_s0 = inlined_call_operand.vmem [shape: bf16[64,32], index: 0, kind: input, shape index: {}]   ;;  %s614_s1 = inlined_call_operand.vmem [shape: bf16[32,128], index: 1, kind: input, shape index: {}]   ;;  %s615_s2 = inlined_call_operand.vmem [shape: f32[1,128], index: 2, kind: input, shape index: {}]   ;;  %s616_s3 = inlined_call_operand.vmem [shape: bf16[128,128], index: 3, kind: input, shape index: {}]   ;;  %s617_s4 = inlined_call_operand.vmem [shape: f32[1,128], index: 4, kind: input, shape index: {}]   ;;  %s618_s5 = inlined_call_operand.vmem [shape: f32[64,128], index: 5, kind: output, shape index: {}]  }
   0x1 LB: > { %s433_s19 = sadd.s32 4294967295, %s524_s18   ;;  %p437_p0 = scmp.ge.s32.totalorder %s524_s18, 1  ;;  %s524_s18 = sphi %s556_s18, %s15_s18  }
   0x2   : > { %p188_p1 = scmp.lt.s32.totalorder %s524_s18, 5 }
   0x4   : > { %p189_p2 = pnand %p437_p0, %p188_p1 }
   0x5   : > { %s438_s22 = sshll.u32 (!%p189_p2), %s433_s19, 1 }
   0x6   : > { %192 = sbr.rel (%p189_p2) target bundleno = 546 (0x222), region = 40  ;;  %p217_p3 = scmp.lt.s32.totalorder (!%p189_p2), %s438_s22, 7 }
   0xb   : > { %v491_v0 = vld [vmem:[%s614_s1 + $0x8] sm:$0xff]  ;;  %v499_v1 = vld [vmem:[%s616_s3 + $0x38] sm:$0xff]  ;;  %v490_v2 = vld [vmem:[%s614_s1] sm:$0xff]  ;;  %s620_s22 = smov (!%p217_p3, %s438_s22), 7  ;;  %vm256_vm0 = vcmask 261120  }
   0xc   : > { %266 = vmatpush.bf16.msra.mxu0 %v491_v0  ;;  %343 = vmatpush.bf16.msra.mxu1 %v499_v1  ;;  %v498_v3 = vld [vmem:[%s616_s3 + $0x30] sm:$0xff]  ;;  %s439_s29 = sshll.u32 %s620_s22, 2  ;;  %v497_v4 = vld [vmem:[%s616_s3 + $0x28] sm:$0xff]  ;;  %v496_v6 = vld [vmem:[%s616_s3 + $0x20] sm:$0xff]  ;;  %s441_s26 = sshll.u32 %s620_s22, 3 }
   0xd   : > { %s220_s7 = scalar_lea.vmem %s613_s0, %s439_s29  ;;  %v495_v7 = vld [vmem:[%s616_s3 + $0x18] sm:$0xff]  ;;  %v494_v8 = vld [vmem:[%s616_s3 + $0x10] sm:$0xff]  ;;  %v493_v9 = vld [vmem:[%s616_s3 + $0x8] sm:$0xff]  ;;  %s226_s29 = scalar_lea.vmem %s618_s5, %s441_s26 }
   0xe   : > { %v489_v5 = vld [vmem:[%s220_s7] sm:$0xff] }
   0xf   : > { %v492_v10 = vld [vmem:[%s616_s3] sm:$0xff] }
  0x10   : > { %267 = vmatpush.bf16.msra.mxu0 %v490_v2  ;;  %344 = vmatpush.bf16.msra.mxu1 %v498_v3  ;;  %v508_v12 = vld [vmem:[%s615_s2] ss:$0 sm:$0xff] }
  0x11   : > { %v509_v17 = vld [vmem:[%s617_s4] ss:$0 sm:$0xff] }
  0x13   : > { %454 = vmatmul.msk.bf16.vlgmr.msra.gmra.mxu0 %vm256_vm0, %v489_v5 }
  0x14   : > { %345 = vmatpush.bf16.msra.mxu1 %v497_v4 }
  0x18   : > { %346 = vmatpush.bf16.msra.mxu1 %v496_v6 }
  0x1c   : > { %347 = vmatpush.bf16.msra.mxu1 %v495_v7 }
  0x20   : > { %348 = vmatpush.bf16.msra.mxu1 %v494_v8 }
  0x24   : > { %349 = vmatpush.bf16.msra.mxu1 %v493_v9 }
  0x28   : > { %350 = vmatpush.bf16.msra.mxu1 %v492_v10 }
  0x90   : > { %v269_v11 = vpop.f32.mrf.mxu0 }
  0x91   : > { %v270_v14 = vadd.f32 %v508_v12, %v269_v11 }
  0x98   : > { %v271_v13 = vpop.f32.mrf.mxu0 }
  0x99   : > { %v272_v15 = vadd.f32 %v508_v12, %v271_v13 }
  0x9b   : > { %v274_v16 = vpack.c.bf16 %v272_v15, %v270_v14 }
  0x9d   : > { %351 = vmatmul.bf16.vlgmr.msra.gmra.mxu1 %v274_v16 }
 0x11a   : > { %v352_v18 = vpop.f32.mrf.mxu1 }
 0x11b   : > { %v353_v19 = vadd.f32 %v509_v17, %v352_v18 }
 0x11d   : > { %357 = vmax.xlane.f32.xlu0 %v353_v19 }
 0x122   : > { %v354_v20 = vpop.f32.mrf.mxu1 }
 0x123   : > { %v355_v21 = vadd.f32 %v509_v17, %v354_v20 }
 0x125   : > { %359 = vmax.xlane.f32.xlu0 %v355_v21 }
 0x190   : > { %v358_v22 = vpop.xlane.xlu0 %357 }
 0x191   : > { %v361_v23 = vsub.f32 %v353_v19, %v358_v22 }
 0x193   : > { %v363_v24 = vmul.f32 1.442695, %v361_v23 }
 0x195   : > { %510 = vpow2.f32 %v363_v24 }
 0x198   : > { %v360_v25 = vpop.xlane.xlu0 %359 }
 0x199   : > { %v362_v26 = vsub.f32 %v355_v21, %v360_v25 }
 0x19b   : > { %v511_v27 = vpop.eup %510  ;;  %v365_v28 = vmul.f32 1.442695, %v362_v26 }
 0x19c   : > { %367 = vadd.xlane.f32.xlu1 %v511_v27 }
 0x19d   : > { %512 = vpow2.f32 %v365_v28 }
 0x1a3   : > { %v513_v29 = vpop.eup %512 }
 0x1a4   : > { %369 = vadd.xlane.f32.xlu1 %v513_v29 }
 0x20f   : > { %v368_v30 = vpop.xlane.xlu1 %367 }
 0x210   : > { %514 = vrcp.f32 %v368_v30 }
 0x216   : > { %v515_v31 = vpop.eup %514 }
 0x217   : > { %v373_v32 = vmul.f32 %v515_v31, %v511_v27  ;;  %v370_v33 = vpop.xlane.xlu1 %369 }
 0x218   : > { %516 = vrcp.f32 %v370_v33 }
 0x219   : > { %375 = vst [vmem:[%s226_s29] sm:$0xff] %v373_v32 }
 0x21e   : > { %v517_v34 = vpop.eup %516 }
 0x21f   : > { %v374_v35 = vmul.f32 %v517_v34, %v513_v29 }
 0x221   : > { %376 = vst [vmem:[%s226_s29 + $0x8] sm:$0xff] %v374_v35 }
 0x222 PF: > { %s15_s18 = sadd.s32 1, %s524_s18  }
 0x223   : > { %p12_p4 = scmp.ge.s32.totalorder %s15_s18, 6  }
 0x225   :  { %14 = sbr.rel (!%p12_p4) target bundleno = 1 (0x1), region = 70 }

</bundles_post_ra>
